<compile_context>
chip_gen: v6e
topology: v6e:2x2x1
jax: 0.10.0
libtpu: 0.0.40
codegen_flags: <defaults>
</compile_context>

<pallas_src>
import functools

import jax
import jax.numpy as jnp
from jax import lax
from jax.experimental import pallas as pl
from jax.experimental.pallas import tpu as pltpu

MEAN = 0.0   # matches RandomJitter(mean=0.0, std=1.0)
STD = 1.0

_LANES = 128
_MAX_BLOCK_ROWS = 2048          # 2048 x 128 f32 = 1 MiB per buffer
_TWO_PI = 6.283185307179586


def _hash32(x):
    """lowbias32 avalanche hash on uint32 vectors (VPU-only: mul/xor/shift)."""
    x = x ^ (x >> 16)
    x = x * jnp.uint32(0x7FEB352D)
    x = x ^ (x >> 15)
    x = x * jnp.uint32(0x846CA68B)
    x = x ^ (x >> 16)
    return x


def _jitter_kernel(seed_ref, x_ref, o_ref, *, mean, std):
    block_rows, cols = x_ref.shape
    base = pl.program_id(0) * block_rows            # global row offset of block
    # Mix the user seed strongly before it enters the per-element counters.
    key = (seed_ref[0].astype(jnp.uint32) * jnp.uint32(0x9E3779B9)
           + jnp.uint32(0x7F4A7C15))

    def uniform01(shape, salt):
        """Per-element uniform in [0, 1) from a counter-based hash."""
        ir = lax.broadcasted_iota(jnp.int32, shape, 0)
        ic = lax.broadcasted_iota(jnp.int32, shape, 1)
        idx = ((base + ir) * cols + ic).astype(jnp.uint32)   # unique element id
        bits = _hash32(idx ^ key ^ jnp.uint32(salt))
        # Mantissa trick: set exponent to 1.0, keep 23 random mantissa bits.
        f = lax.bitcast_convert_type((bits >> 9) | jnp.uint32(0x3F800000),
                                     jnp.float32)
        return f - 1.0

    # Dual-output Box-Muller when the two halves stay sublane-aligned.
    if block_rows % 16 == 0:
        half = block_rows // 2
        shp = (half, cols)
        u1 = 1.0 - uniform01(shp, 0x68E31DA4)       # (0, 1] -> log is safe
        u2 = uniform01(shp, 0xB5297A4D)             # [0, 1)
        r = jnp.sqrt(-2.0 * jnp.log(u1))
        theta = _TWO_PI * u2
        z1 = r * jnp.cos(theta)
        z2 = r * jnp.sin(theta)
        x1 = x_ref[:half, :].astype(jnp.float32)
        x2 = x_ref[half:, :].astype(jnp.float32)
        o_ref[:half, :] = (x1 + (mean + std * z1)).astype(o_ref.dtype)
        o_ref[half:, :] = (x2 + (mean + std * z2)).astype(o_ref.dtype)
    else:
        shp = (block_rows, cols)
        u1 = 1.0 - uniform01(shp, 0x68E31DA4)
        u2 = uniform01(shp, 0xB5297A4D)
        z = jnp.sqrt(-2.0 * jnp.log(u1)) * jnp.cos(_TWO_PI * u2)
        o_ref[...] = (x_ref[...].astype(jnp.float32)
                      + (mean + std * z)).astype(o_ref.dtype)


def random_jitter(x, seed, *, mean=MEAN, std=STD):
    """x: any-shaped array (e.g. NCHW). Returns x + N(mean, std) noise."""
    orig_shape = x.shape
    orig_dtype = x.dtype
    # Math is always f32 in-kernel; store back in the input float dtype.
    # Integer inputs are promoted to f32 (torch would also promote).
    out_dtype = orig_dtype if jnp.issubdtype(orig_dtype, jnp.floating) else jnp.float32

    total = 1
    for d in orig_shape:
        total *= int(d)
    if total == 0:
        return x.astype(out_dtype)

    cols = _LANES
    x_flat = jnp.reshape(x, (-1,)).astype(out_dtype)   # no f32 upcast pass
    pad = (-total) % cols                              # pad only to a lane multiple
    if pad:
        x_flat = jnp.pad(x_flat, (0, pad))
    rows = (total + pad) // cols
    x2d = jnp.reshape(x_flat, (rows, cols))

    # Big, VMEM-safe blocks (block_rows is either the full row dim or a
    # multiple of 8); last block may be partial (Pallas masks the edge).
    block_rows = min(_MAX_BLOCK_ROWS, rows)
    grid = (pl.cdiv(rows, block_rows),)

    seed_arr = jnp.asarray([seed], dtype=jnp.int32)
    kernel = functools.partial(_jitter_kernel, mean=float(mean), std=float(std))

    out2d = pl.pallas_call(
        kernel,
        out_shape=jax.ShapeDtypeStruct((rows, cols), out_dtype),
        grid_spec=pltpu.PrefetchScalarGridSpec(
            num_scalar_prefetch=1,
            grid=grid,
            in_specs=[
                pl.BlockSpec((block_rows, cols), lambda i, seed: (i, 0)),
            ],
            out_specs=pl.BlockSpec((block_rows, cols), lambda i, seed: (i, 0)),
        ),
        compiler_params=pltpu.CompilerParams(
            dimension_semantics=("parallel",),   # independent blocks -> both TCs on v7x
        ),
    )(seed_arr, x2d)

    out_flat = jnp.reshape(out2d, (-1,))
    if pad:
        out_flat = out_flat[:total]
    return jnp.reshape(out_flat, orig_shape)


if __name__ == "__main__":
    key = jax.random.PRNGKey(0)
    # NCHW input, as RandomJitter would see from a PyTorch pipeline.
    x = jax.random.normal(key, (2, 4, 16, 16), dtype=jnp.float32)

    y = random_jitter(x, seed=42)
    y = jax.block_until_ready(y)

    # Basic sanity: same shape/dtype, noise has roughly unit std / zero mean.
    assert y.shape == x.shape and y.dtype == x.dtype
    noise = y - x
    m = float(jnp.mean(noise))
    s = float(jnp.std(noise))
    assert abs(m - MEAN) < 0.2, f"noise mean off: {m}"
    assert abs(s - STD) < 0.2, f"noise std off: {s}"

    print("KERNEL_OK")
</pallas_src>

<mosaic_0001>
module attributes {stable_mosaic.version = 11 : i64} {
  func.func @_jitter_kernel(%arg0: i32, %arg1: memref<1xi32, #tpu.memory_space<smem>>, %arg2: memref<16x128xf32, #tpu.memory_space<vmem>>, %arg3: memref<16x128xf32, #tpu.memory_space<vmem>>) attributes {dimension_semantics = [#tpu.dimension_semantics<parallel>], iteration_bounds = array<i64: 1>, scalar_prefetch = 1 : i64, scratch_operands = 0 : i64, tpu.core_type = #tpu.core_type<tc>, window_params = [{transform_indices = @transform_0, window_bounds = array<i64: 16, 128>}, {transform_indices = @transform_1, window_bounds = array<i64: 16, 128>}]} {
    %c16_i32 = arith.constant 16 : i32
    %0 = arith.muli %arg0, %c16_i32 : i32
    %c0 = arith.constant 0 : index
    %1 = memref.load %arg1[%c0] : memref<1xi32, #tpu.memory_space<smem>>
    %c-1640531527_i32 = arith.constant -1640531527 : i32
    %2 = arith.muli %1, %c-1640531527_i32 : i32
    %c2135587861_i32 = arith.constant 2135587861 : i32
    %3 = arith.addi %2, %c2135587861_i32 : i32
    %4 = tpu.iota {dimensions = array<i32: 0>} : vector<8x128xi32>
    %5 = tpu.iota {dimensions = array<i32: 1>} : vector<8x128xi32>
    %6 = vector.broadcast %0 : i32 to vector<8x128xi32>
    %7 = arith.addi %6, %4 : vector<8x128xi32>
    %c128_i32 = arith.constant 128 : i32
    %8 = vector.broadcast %c128_i32 : i32 to vector<8x128xi32>
    %9 = arith.muli %7, %8 : vector<8x128xi32>
    %10 = arith.addi %9, %5 : vector<8x128xi32>
    %11 = vector.broadcast %3 : i32 to vector<8x128xi32>
    %12 = arith.xori %10, %11 : vector<8x128xi32>
    %c1759714724_i32 = arith.constant 1759714724 : i32
    %13 = vector.broadcast %c1759714724_i32 : i32 to vector<8x128xi32>
    %14 = arith.xori %12, %13 : vector<8x128xi32>
    %c16_i32_0 = arith.constant 16 : i32
    %15 = vector.broadcast %c16_i32_0 : i32 to vector<8x128xi32>
    %16 = arith.shrui %14, %15 : vector<8x128xi32>
    %17 = arith.xori %14, %16 : vector<8x128xi32>
    %c2146121005_i32 = arith.constant 2146121005 : i32
    %18 = vector.broadcast %c2146121005_i32 : i32 to vector<8x128xi32>
    %19 = arith.muli %17, %18 : vector<8x128xi32>
    %c15_i32 = arith.constant 15 : i32
    %20 = vector.broadcast %c15_i32 : i32 to vector<8x128xi32>
    %21 = arith.shrui %19, %20 : vector<8x128xi32>
    %22 = arith.xori %19, %21 : vector<8x128xi32>
    %c-2073254261_i32 = arith.constant -2073254261 : i32
    %23 = vector.broadcast %c-2073254261_i32 : i32 to vector<8x128xi32>
    %24 = arith.muli %22, %23 : vector<8x128xi32>
    %c16_i32_1 = arith.constant 16 : i32
    %25 = vector.broadcast %c16_i32_1 : i32 to vector<8x128xi32>
    %26 = arith.shrui %24, %25 : vector<8x128xi32>
    %27 = arith.xori %24, %26 : vector<8x128xi32>
    %c9_i32 = arith.constant 9 : i32
    %28 = vector.broadcast %c9_i32 : i32 to vector<8x128xi32>
    %29 = arith.shrui %27, %28 : vector<8x128xi32>
    %c1065353216_i32 = arith.constant 1065353216 : i32
    %30 = vector.broadcast %c1065353216_i32 : i32 to vector<8x128xi32>
    %31 = arith.ori %29, %30 : vector<8x128xi32>
    %32 = tpu.bitcast %31 : vector<8x128xi32> -> vector<8x128xf32>
    %cst = arith.constant 1.000000e+00 : f32
    %33 = vector.broadcast %cst : f32 to vector<8x128xf32>
    %34 = arith.subf %32, %33 : vector<8x128xf32>
    %cst_2 = arith.constant 1.000000e+00 : f32
    %35 = vector.broadcast %cst_2 : f32 to vector<8x128xf32>
    %36 = arith.subf %35, %34 : vector<8x128xf32>
    %37 = tpu.iota {dimensions = array<i32: 0>} : vector<8x128xi32>
    %38 = tpu.iota {dimensions = array<i32: 1>} : vector<8x128xi32>
    %39 = vector.broadcast %0 : i32 to vector<8x128xi32>
    %40 = arith.addi %39, %37 : vector<8x128xi32>
    %c128_i32_3 = arith.constant 128 : i32
    %41 = vector.broadcast %c128_i32_3 : i32 to vector<8x128xi32>
    %42 = arith.muli %40, %41 : vector<8x128xi32>
    %43 = arith.addi %42, %38 : vector<8x128xi32>
    %44 = vector.broadcast %3 : i32 to vector<8x128xi32>
    %45 = arith.xori %43, %44 : vector<8x128xi32>
    %c-1255572915_i32 = arith.constant -1255572915 : i32
    %46 = vector.broadcast %c-1255572915_i32 : i32 to vector<8x128xi32>
    %47 = arith.xori %45, %46 : vector<8x128xi32>
    %c16_i32_4 = arith.constant 16 : i32
    %48 = vector.broadcast %c16_i32_4 : i32 to vector<8x128xi32>
    %49 = arith.shrui %47, %48 : vector<8x128xi32>
    %50 = arith.xori %47, %49 : vector<8x128xi32>
    %c2146121005_i32_5 = arith.constant 2146121005 : i32
    %51 = vector.broadcast %c2146121005_i32_5 : i32 to vector<8x128xi32>
    %52 = arith.muli %50, %51 : vector<8x128xi32>
    %c15_i32_6 = arith.constant 15 : i32
    %53 = vector.broadcast %c15_i32_6 : i32 to vector<8x128xi32>
    %54 = arith.shrui %52, %53 : vector<8x128xi32>
    %55 = arith.xori %52, %54 : vector<8x128xi32>
    %c-2073254261_i32_7 = arith.constant -2073254261 : i32
    %56 = vector.broadcast %c-2073254261_i32_7 : i32 to vector<8x128xi32>
    %57 = arith.muli %55, %56 : vector<8x128xi32>
    %c16_i32_8 = arith.constant 16 : i32
    %58 = vector.broadcast %c16_i32_8 : i32 to vector<8x128xi32>
    %59 = arith.shrui %57, %58 : vector<8x128xi32>
    %60 = arith.xori %57, %59 : vector<8x128xi32>
    %c9_i32_9 = arith.constant 9 : i32
    %61 = vector.broadcast %c9_i32_9 : i32 to vector<8x128xi32>
    %62 = arith.shrui %60, %61 : vector<8x128xi32>
    %c1065353216_i32_10 = arith.constant 1065353216 : i32
    %63 = vector.broadcast %c1065353216_i32_10 : i32 to vector<8x128xi32>
    %64 = arith.ori %62, %63 : vector<8x128xi32>
    %65 = tpu.bitcast %64 : vector<8x128xi32> -> vector<8x128xf32>
    %cst_11 = arith.constant 1.000000e+00 : f32
    %66 = vector.broadcast %cst_11 : f32 to vector<8x128xf32>
    %67 = arith.subf %65, %66 : vector<8x128xf32>
    %68 = math.log %36 : vector<8x128xf32>
    %cst_12 = arith.constant -2.000000e+00 : f32
    %69 = vector.broadcast %cst_12 : f32 to vector<8x128xf32>
    %70 = arith.mulf %69, %68 : vector<8x128xf32>
    %71 = math.sqrt %70 : vector<8x128xf32>
    %cst_13 = arith.constant 6.28318548 : f32
    %72 = vector.broadcast %cst_13 : f32 to vector<8x128xf32>
    %73 = arith.mulf %72, %67 : vector<8x128xf32>
    %74 = math.cos %73 : vector<8x128xf32>
    %75 = arith.mulf %71, %74 : vector<8x128xf32>
    %76 = math.sin %73 : vector<8x128xf32>
    %77 = arith.mulf %71, %76 : vector<8x128xf32>
    %c0_14 = arith.constant 0 : index
    %c0_15 = arith.constant 0 : index
    %78 = vector.load %arg2[%c0_14, %c0_15] : memref<16x128xf32, #tpu.memory_space<vmem>>, vector<8x128xf32>
    %c8 = arith.constant 8 : index
    %c0_16 = arith.constant 0 : index
    %79 = vector.load %arg2[%c8, %c0_16] : memref<16x128xf32, #tpu.memory_space<vmem>>, vector<8x128xf32>
    %cst_17 = arith.constant 1.000000e+00 : f32
    %80 = vector.broadcast %cst_17 : f32 to vector<8x128xf32>
    %81 = arith.mulf %80, %75 : vector<8x128xf32>
    %cst_18 = arith.constant 0.000000e+00 : f32
    %82 = vector.broadcast %cst_18 : f32 to vector<8x128xf32>
    %83 = arith.addf %82, %81 : vector<8x128xf32>
    %84 = arith.addf %78, %83 : vector<8x128xf32>
    %c0_19 = arith.constant 0 : index
    %c0_20 = arith.constant 0 : index
    %85 = vector.load %arg3[%c0_19, %c0_20] : memref<16x128xf32, #tpu.memory_space<vmem>>, vector<8x128xf32>
    tpu.vector_store %arg3[%c0_19, %c0_20], %84 {strides = array<i32>} : memref<16x128xf32, #tpu.memory_space<vmem>>, vector<8x128xf32>,
    %cst_21 = arith.constant 1.000000e+00 : f32
    %86 = vector.broadcast %cst_21 : f32 to vector<8x128xf32>
    %87 = arith.mulf %86, %77 : vector<8x128xf32>
    %cst_22 = arith.constant 0.000000e+00 : f32
    %88 = vector.broadcast %cst_22 : f32 to vector<8x128xf32>
    %89 = arith.addf %88, %87 : vector<8x128xf32>
    %90 = arith.addf %79, %89 : vector<8x128xf32>
    %c8_23 = arith.constant 8 : index
    %c0_24 = arith.constant 0 : index
    %91 = vector.load %arg3[%c8_23, %c0_24] : memref<16x128xf32, #tpu.memory_space<vmem>>, vector<8x128xf32>
    tpu.vector_store %arg3[%c8_23, %c0_24], %90 {strides = array<i32>} : memref<16x128xf32, #tpu.memory_space<vmem>>, vector<8x128xf32>,
    return
  }
  func.func @transform_0(%arg0: i32, %arg1: memref<1xi32, #tpu.memory_space<smem>>) -> (i32, i32) {
    %c0_i32 = arith.constant 0 : i32
    %c0_i32_0 = arith.constant 0 : i32
    return %arg0, %c0_i32 : i32, i32
  }
  func.func @transform_1(%arg0: i32, %arg1: memref<1xi32, #tpu.memory_space<smem>>) -> (i32, i32) {
    %c0_i32 = arith.constant 0 : i32
    %c0_i32_0 = arith.constant 0 : i32
    return %arg0, %c0_i32 : i32, i32
  }
}

</mosaic_0001>

<bundles_post_ra>
// kernel: tpu_custom_call.1
= control target key start
LH: loop header
LB: loop body
LE: loop exit
PB: predicated region body
PF: predicated region fallthrough
CT: control target
= control target key end

     0   :  { %8 = vsyncpa [#allocation5], 0  ;;  %s448_s0 = inlined_call_operand.<no memory space> [shape: s32[1], index: 0, kind: input, shape index: {}]   ;;  %s449_s1 = inlined_call_operand.hbm [shape: f32[16,128], index: 1, kind: input, shape index: {}]   ;;  %s450_s2 = inlined_call_operand.hbm [shape: f32[16,128], index: 2, kind: output, shape index: {}]  }
   0x1   :  { %9 = vsyncpa [#allocation6], 0  ;;  %s387_s9 = smov [#allocation4]  }
   0x2   :  { %s15_s10 = sshll.u32 %s387_s9, 4  ;;  %s16_s10 = int_to_ptr.vmem [resolvable:$true] %s15_s10 }
   0x3   :  { %s351_s11 = scalar_lea.vmem %s16_s10, 256  ;;  %p356_p1 = scmp.lt.s32.totalorder %s16_s10, %s16_s10 }
   0x4   :  { %p352_p0 = scmp.ne.s32.totalorder %s16_s10, %s351_s11  ;;  %p357_p2 = scmp.lt.s32.totalorder %s351_s11, %s351_s11 }
   0x6   :  { %p358_p3 = por %p357_p2, %p356_p1 }
   0x8   :  { %p359_p4 = pnand %p358_p3, %p352_p0 }
   0xa   :  { %362 = shalt.err (!%p359_p4)
}
   0xb   :  { %s388_s12 = smov 128   ;;  %s389_s13 = smov 8  }
   0xc   :  { %21 = dma.hbm_to_vmem [thread:$0]  %s449_s1, 256, %s16_s10, [#allocation5], %s388_s12, %s388_s12, %s389_s13  }
   0xd   :  { %383 = dma.done.wait [#allocation5], 256  }
   0xe   :  { %384 = vsyncadd [#allocation5], 4294967040  ;;  %s27_s18 = smul.u32 2654435769, %s448_s0  ;;  %v29_v0 = vlaneseq  ;;  %v390_v38 = vmov 683565275  }
   0xf   :  { %v391_v40 = vmov 2475754826   ;;  %v392_v42 = vmov 2131351028   ;;  %v393_v44 = vmov 2102212464  }
  0x10   :  { %s28_s19 = sadd.s32 2135587861, %s27_s18  ;;  %v30_v1 = vshrl.u32 %v29_v0, 7  ;;  %v32_v2 = vand.u32 127, %v29_v0  ;;  %v394_v46 = vmov 920167782  }
  0x11   :  { %v37_v4 = vstv %s28_s19  ;;  %v395_v55 = vmov 1326507024   ;;  %s396_s0 = smov [#allocation7]  }
  0x12   :  { %v35_v3 = vmul.u32 128, %v30_v1  ;;  %s299_s1 = sshll.u32 %s396_s0, 4  ;;  %s300_s1 = int_to_ptr.vmem [resolvable:$true] %s299_s1 }
  0x13   :  { %s363_s20 = scalar_lea.vmem %s300_s1, 256  ;;  %p368_p6 = scmp.lt.s32.totalorder %s300_s1, %s300_s1 }
  0x14   :  { %v36_v5 = vadd.s32 %v35_v3, %v32_v2  ;;  %p364_p5 = scmp.ne.s32.totalorder %s300_s1, %s363_s20  ;;  %p369_p7 = scmp.lt.s32.totalorder %s363_s20, %s363_s20 }
  0x16   :  { %v38_v6 = vxor.u32 %v37_v4, %v36_v5  ;;  %p370_p8 = por %p369_p7, %p368_p6 }
  0x18   :  { %v53_v7 = vxor.u32 3039394381, %v38_v6  ;;  %v39_v11 = vxor.u32 1759714724, %v38_v6  ;;  %p371_p9 = pnand %p370_p8, %p364_p5 }
  0x1a   :  { %v54_v8 = vshrl.u32 %v53_v7, 16  ;;  %v40_v14 = vshrl.u32 %v39_v11, 16 }
  0x1c   :  { %v55_v9 = vxor.u32 %v54_v8, %v53_v7  ;;  %v41_v17 = vxor.u32 %v40_v14, %v39_v11 }
  0x1e   :  { %v56_v10 = vmul.u32 2146121005, %v55_v9  ;;  %v42_v20 = vmul.u32 2146121005, %v41_v17 }
  0x20   :  { %v57_v12 = vshrl.u32 %v56_v10, 15  ;;  %v43_v23 = vshrl.u32 %v42_v20, 15 }
  0x22   :  { %v58_v13 = vxor.u32 %v57_v12, %v56_v10  ;;  %v44_v26 = vxor.u32 %v43_v23, %v42_v20 }
  0x24   :  { %v59_v15 = vmul.u32 2221713035, %v58_v13  ;;  %v45_v29 = vmul.u32 2221713035, %v44_v26 }
  0x26   :  { %v60_v16 = vshrl.u32 %v59_v15, 16  ;;  %v46_v33 = vshrl.u32 %v45_v29, 16 }
  0x28   :  { %v61_v18 = vxor.u32 %v60_v16, %v59_v15  ;;  %v47_v48 = vxor.u32 %v46_v33, %v45_v29 }
  0x2a   :  { %v62_v19 = vshrl.u32 %v61_v18, 9  ;;  %v48_v62 = vshrl.u32 %v47_v48, 9 }
  0x2c   :  { %v63_v21 = vor.u32 1065353216, %v62_v19  ;;  %v49_v14 = vor.u32 1065353216, %v48_v62 }
  0x2e   :  { %v312_v22 = vadd.f32 -1.0, %v63_v21  ;;  %v311_v19 = vadd.f32 -1.0, %v49_v14 }
  0x30   :  { %v421_v24 = vmul.f32 6.2831855, %v312_v22  ;;  %v52_v22 = vsub.f32 1.0, %v311_v19 }
  0x32   :  { %v80_v25 = vand.u32 2139095040, %v421_v24  ;;  %v77_v30 = vand.u32 2147483647, %v421_v24  ;;  %335 = vlog2.f32 %v52_v22  ;;  %vm79_vm7 = vcmp.lt.s32.totalorder %v421_v24, 0 }
  0x34   :  { %v81_v27 = vshrl.u32 %v80_v25, 23  ;;  %v84_v34 = vand.u32 8388607, %v77_v30  ;;  %vm78_vm8 = vcmp.le.f32.partialorder %v77_v30, 0.7853982 }
  0x36   :  { %v313_v28 = vadd.s32 4294967169, %v81_v27  ;;  %v85_v49 = vor.u32 8388608, %v84_v34 }
  0x38   :  { %v87_v31 = vadd.s32 1, %v313_v28  ;;  %v125_v63 = vshll.u32 %v85_v49, 8 }
  0x3a   :  { %vm88_vm0 = vcmp.gt.s32.totalorder %v87_v31, 0 }
  0x3b   :  { %v89_v32 = vsel %vm88_vm0, %v87_v31, 0 }
  0x3c   :  { %v91_v35 = vand.u32 31, %v89_v32  ;;  %v90_v36 = vshrl.u32 %v89_v32, 5 }
  0x3e   :  { %v92_v37 = vsub.s32 32, %v91_v35  ;;  %v94_v39 = vshll.u32 %v390_v38, %v91_v35  ;;  %v97_v41 = vshll.u32 %v391_v40, %v91_v35  ;;  %v100_v43 = vshll.u32 %v392_v42, %v91_v35 }
  0x3f   :  { %v103_v45 = vshll.u32 %v393_v44, %v91_v35  ;;  %v106_v47 = vshll.u32 %v394_v46, %v91_v35  ;;  %vm109_vm1 = vcmp.lt.s32.totalorder %v90_v36, 1  ;;  %vm112_vm2 = vcmp.lt.s32.totalorder %v90_v36, 4  ;;  %v336_v34 = vpop.eup %335 }
  0x40   :  { %v95_v50 = vshrl.u32 %v391_v40, %v92_v37  ;;  %v98_v51 = vshrl.u32 %v392_v42, %v92_v37  ;;  %v93_v52 = vshrl.u32 %v390_v38, %v92_v37  ;;  %v101_v53 = vshrl.u32 %v393_v44, %v92_v37 }
  0x41   :  { %v104_v54 = vshrl.u32 %v394_v46, %v92_v37  ;;  %v107_v56 = vshrl.u32 %v395_v55, %v92_v37  ;;  %vm111_vm3 = vcmp.lt.s32.totalorder %v90_v36, 3  ;;  %vm110_vm4 = vcmp.lt.s32.totalorder %v90_v36, 2 }
  0x42   :  { %v96_v57 = vor.u32 %v95_v50, %v94_v39  ;;  %v99_v58 = vor.u32 %v98_v51, %v97_v41  ;;  %v102_v59 = vor.u32 %v101_v53, %v100_v43  ;;  %v67_v39 = vmul.f32 0.6931472, %v336_v34 }
  0x43   :  { %v105_v60 = vor.u32 %v104_v54, %v103_v45  ;;  %v108_v61 = vor.u32 %v107_v56, %v106_v47 }
  0x44   :  { %v113_v0 = vsel %vm109_vm1, %v93_v52, %v96_v57  ;;  %v114_v1 = vsel %vm112_vm2, %v102_v59, 2102212464  ;;  %v117_v2 = vsel %vm109_vm1, %v96_v57, %v99_v58  ;;  %v121_v6 = vsel %vm109_vm1, %v99_v58, %v102_v59 }
  0x45   :  { %v118_v3 = vsel %vm112_vm2, %v105_v60, 920167782  ;;  %v115_v4 = vsel %vm111_vm3, %v99_v58, %v114_v1  ;;  %v122_v7 = vsel %vm112_vm2, %v108_v61, 1326507024  ;;  %v68_v44 = vmul.f32 -2.0, %v67_v39 }
  0x46   :  { %v119_v5 = vsel %vm111_vm3, %v102_v59, %v118_v3  ;;  %v123_v9 = vsel %vm111_vm3, %v105_v60, %v122_v7  ;;  %v116_v10 = vsel %vm110_vm4, %v113_v0, %v115_v4  ;;  %vm169_vm1 = vweird.f32 %v421_v24 }
  0x47   :  { %v120_v8 = vsel %vm110_vm4, %v117_v2, %v119_v5  ;;  %v124_v11 = vsel %vm110_vm4, %v121_v6, %v123_v9  ;;  %v132_v17 = vmul.u32 %v125_v63, %v116_v10  ;;  %337 = vrsqrt.f32 %v68_v44  ;;  %v286_v9 = vld [vmem:[#allocation4] sm:$0xff] }
  0x48   :  { %v427_v12 = vmul.u32.u64.low %v125_v63, %v120_v8  ;;  %v428_v13 = vmul.u32.u64.high %v125_v63, %v120_v8, %v427_v12  ;;  %v430_v15 = vmul.u32.u64.low %v125_v63, %v124_v11  ;;  %v431_v16 = vmul.u32.u64.high %v125_v63, %v124_v11, %v430_v15  ;;  %v287_v11 = vld [vmem:[#allocation4 + $0x8] sm:$0xff] }
  0x49   :  { %vm71_vm9 = vcmp.eq.f32.partialorder %v68_v44, inf  ;;  %vm73_vm10 = vcmp.eq.f32.partialorder %v68_v44, 0.0  ;;  %v74_v61 = vand.u32 2147483648, %v68_v44 }
  0x4a   :  { %v135_v18 = vadd.s32 1, %v428_v13  ;;  %vm134_vm5 = vc.u32 %v431_v16, %v427_v12  ;;  %v133_v33 = vadd.s32 %v427_v12, %v431_v16 }
  0x4c   :  { %v136_v20 = vsel %vm134_vm5, %v135_v18, %v428_v13 }
  0x4d   :  { %v137_v21 = vadd.s32 %v136_v20, %v132_v17 }
  0x4f   :  { %v138_v23 = vadd.s32 536870912, %v137_v21 }
  0x51   :  { %v139_v25 = vshrl.u32 %v138_v23, 30 }
  0x53   :  { %v140_v26 = vshll.u32 %v139_v25, 30  ;;  %v163_v49 = vsub.s32 4, %v139_v25 }
  0x54   :  { %v338_v56 = vpop.eup %337 }
  0x55   :  { %v141_v27 = vsub.s32 %v137_v21, %v140_v26  ;;  %v164_v52 = vsel %vm79_vm7, %v163_v49, %v139_v25  ;;  %v70_v59 = vmul.f32 %v338_v56, %v68_v44 }
  0x56   :  { %v166_v54 = vsel %vm78_vm8, 0, %v164_v52 }
  0x57   :  { %v143_v28 = vsub.s32 0, %v141_v27  ;;  %v274_v55 = vadd.s32 3, %v166_v54  ;;  %v170_v57 = vand.u32 3, %v166_v54  ;;  %v72_v62 = vsel %vm71_vm9, %v68_v44, %v70_v59 }
  0x58   :  { %v75_v3 = vsel %vm73_vm10, %v74_v61, %v72_v62 }
  0x59   :  { %v314_v29 = vmin.u32 %v143_v28, %v141_v27  ;;  %v275_v58 = vand.u32 3, %v274_v55  ;;  %vm175_vm11 = vcmp.eq.s32.totalorder %v170_v57, 2  ;;  %vm172_vm13 = vcmp.eq.s32.totalorder %v170_v57, 0 }
  0x5a   :  { %vm171_vm15 = vcmp.lt.s32.totalorder %v170_v57, 2 }
  0x5b   :  { %v145_v31 = vclz %v314_v29  ;;  %vm280_vm12 = vcmp.eq.s32.totalorder %v275_v58, 2  ;;  %vm277_vm14 = vcmp.eq.s32.totalorder %v275_v58, 0  ;;  %vm276_vm0 = vcmp.lt.s32.totalorder %v275_v58, 2 }
  0x5d   :  { %v315_v32 = vadd.s32 4294967294, %v145_v31 }
  0x5f   :  { %vm316_vm6 = vcmp.lt.s32.totalorder %v315_v32, 0 }
  0x60   :  { %v148_v35 = vsel %vm316_vm6, 0, %v315_v32 }
  0x61   :  { %v149_v36 = vsub.s32 32, %v148_v35  ;;  %v150_v37 = vshll.u32 %v141_v27, %v148_v35  ;;  %v153_v38 = vsub.s32 4294967266, %v148_v35 }
  0x63   :  { %v151_v40 = vshrl.u32 %v133_v33, %v149_v36  ;;  %v154_v41 = vadd.s32 127, %v153_v38 }
  0x65   :  { %v152_v42 = vor.u32 %v151_v40, %v150_v37  ;;  %v155_v43 = vshll.u32 %v154_v41, 23 }
  0x67   :  { %v156_v45 = vor.u32 4788187, %v155_v43  ;;  %v159_v46 = vcvt.s32.f32 %v152_v42 }
  0x69   :  { %v157_v47 = vand.u32 2147483647, %v156_v45 }
  0x6b   :  { %v160_v48 = vmul.f32 %v159_v46, %v157_v47 }
  0x6d   :  { %v161_v50 = vxor.u32 2147483648, %v160_v48 }
  0x6f   :  { %v162_v51 = vsel %vm79_vm7, %v161_v50, %v160_v48 }
  0x70   :  { %v165_v53 = vsel %vm78_vm8, %v421_v24, %v162_v51 }
  0x71   :  { %339 = vcosq.f32 %v165_v53 }
  0x72   :  { %341 = vsinq.f32 %v165_v53 }
  0x7e   :  { %v340_v60 = vpop.eup %339 }
  0x7f   :  { %v342_v30 = vpop.eup %341  ;;  %v176_v63 = vxor.u32 2147483648, %v340_v60 }
  0x80   :  { %v173_v0 = vxor.u32 2147483648, %v342_v30 }
  0x81   :  { %v177_v1 = vsel %vm175_vm11, %v176_v63, %v342_v30  ;;  %v282_v2 = vsel %vm280_vm12, %v176_v63, %v342_v30 }
  0x82   :  { %v174_v4 = vsel %vm172_vm13, %v340_v60, %v173_v0  ;;  %v279_v5 = vsel %vm277_vm14, %v340_v60, %v173_v0 }
  0x83   :  { %v178_v6 = vsel %vm171_vm15, %v174_v4, %v177_v1  ;;  %v283_v7 = vsel %vm276_vm0, %v279_v5, %v282_v2 }
  0x84   :  { %v179_v8 = vsel %vm169_vm1, nan, %v178_v6  ;;  %v284_v10 = vsel %vm169_vm1, nan, %v283_v7 }
  0x85   :  { %v180_v12 = vmul.f32 %v179_v8, %v75_v3  ;;  %v285_v13 = vmul.f32 %v284_v10, %v75_v3 }
  0x87   :  { %v289_v14 = vadd.f32 %v286_v9, %v180_v12  ;;  %v292_v15 = vadd.f32 %v287_v11, %v285_v13 }
  0x89   :  { %290 = vst [vmem:[#allocation7] sm:$0xff] %v289_v14  ;;  %293 = vst [vmem:[#allocation7 + $0x8] sm:$0xff] %v292_v15 }
  0x8a   :  { %374 = shalt.err (!%p371_p9)
}
  0x8b   :  { %305 = dma.vmem_to_hbm [thread:$0]  %s300_s1, 256, %s450_s2, [#allocation6], %s388_s12, %s388_s12, %s389_s13  }
  0x8c   :  { %385 = dma.done.wait [#allocation6], 256  }
  0x8d   :  { %386 = vsyncadd [#allocation6], 4294967040 }
  0x8e   :  { %309 = vsyncpa [#allocation5], 1 }
  0x8f   :  { %310 = vsyncpa [#allocation6], 1 }

</bundles_post_ra>
